<compile_context>
chip_gen: v6e
topology: v6e:2x2x1
jax: 0.10.0
libtpu: 0.0.40
codegen_flags: <defaults>
</compile_context>

<pallas_src>
import math

import jax
import jax.numpy as jnp
from jax.experimental import pallas as pl
from jax.experimental.pallas import tpu as pltpu


def _drop_path_kernel(x_ref, s_ref, o_ref):
    # x_ref/o_ref: (TB, TN) VMEM tiles.  s_ref: (TB, 1) per-sample scale in
    # f32; the multiply promotes, the cast on store lands in x.dtype.
    o_ref[...] = (x_ref[...] * s_ref[...]).astype(o_ref.dtype)


def _select_tiles(B, N, itemsize):
    """Pick (TB, TN) block shape: lane-dense, ~2 MiB per buffer."""
    LANE = 128
    sub = max(8, 32 // itemsize)          # 8 for f32, 16 for bf16, 32 for i8/fp8
    target = 2 * 1024 * 1024              # ~2 MiB per block buffer

    total = B * N * itemsize
    if total <= target:
        # Single block covering the whole array (full dims are always legal).
        return B, N

    row_bytes = N * itemsize
    rows_in_budget = target // row_bytes
    if rows_in_budget >= sub:
        # Full-width slabs of whole rows -> fully contiguous HBM DMA.
        TB = min(B, (rows_in_budget // sub) * sub)
        return TB, N

    # N alone is too wide: narrow (sublane-aligned) batch tile, wide lane tile.
    TB = B if B <= sub else sub
    TN = (target // (TB * itemsize)) // LANE * LANE
    TN = max(TN, LANE)
    if TN >= N:
        TN = N
    return TB, TN


def drop_path(x, drop_prob: float = 0.0, training: bool = False, *, key=None):
    """Pallas-backed stochastic depth.  x: any shape with batch as dim 0."""
    if drop_prob == 0.0 or not training:
        return x
    if drop_prob >= 1.0:
        raise ValueError("drop_prob must be < 1.0 (keep_prob would be 0).")
    assert key is not None, "need a PRNG key when training with drop_prob > 0"

    keep_prob = 1.0 - drop_prob
    B = x.shape[0]
    N = int(math.prod(x.shape[1:]))
    itemsize = jnp.dtype(x.dtype).itemsize
    xf = x.reshape(B, N)

    # Per-sample binary keep mask: floor(keep_prob + U[0,1)) in {0, 1};
    # kept in f32 so 1/keep_prob is not quantized for low-precision x.
    u = jax.random.uniform(key, (B,), dtype=jnp.float32)
    mask = jnp.floor(keep_prob + u)
    scale = (mask * (1.0 / keep_prob)).reshape(B, 1)  # f32 (B, 1)

    TB, TN = _select_tiles(B, N, itemsize)
    grid = (pl.cdiv(B, TB), pl.cdiv(N, TN))

    cost = pl.CostEstimate(
        flops=B * N,
        transcendentals=0,
        bytes_accessed=2 * B * N * itemsize + B * 4,
    )

    out = pl.pallas_call(
        _drop_path_kernel,
        out_shape=jax.ShapeDtypeStruct((B, N), x.dtype),
        grid=grid,
        in_specs=[
            pl.BlockSpec((TB, TN), lambda i, j: (i, j)),
            pl.BlockSpec((TB, 1), lambda i, j: (i, 0)),
        ],
        out_specs=pl.BlockSpec((TB, TN), lambda i, j: (i, j)),
        compiler_params=pltpu.CompilerParams(
            dimension_semantics=("parallel", "parallel")),
        cost_estimate=cost,
    )(xf, scale)

    return out.reshape(x.shape)


class DropPath:
    """Minimal JAX analogue of the PyTorch DropPath module."""

    def __init__(self, drop_prob=None):
        self.drop_prob = 0.0 if drop_prob is None else float(drop_prob)
        self.training = True

    def __call__(self, x, *, key=None):
        return drop_path(x, self.drop_prob, self.training, key=key)


def _ref_drop_path(x, drop_prob, key):
    """Pure-JAX reference (computed in f32, cast to x.dtype)."""
    keep_prob = 1.0 - drop_prob
    u = jax.random.uniform(key, (x.shape[0],), dtype=jnp.float32)
    mask = jnp.floor(keep_prob + u)
    scale = (mask * (1.0 / keep_prob)).reshape((-1,) + (1,) * (x.ndim - 1))
    return (x.astype(jnp.float32) * scale).astype(x.dtype)


if __name__ == "__main__":
    root = jax.random.PRNGKey(0)
    kx, km, kx2, km2, kx3, km3, kx4, km4 = jax.random.split(root, 8)

    # --- test 1: small NCHW input, lane-aligned feature size (single block) ---
    x = jax.random.normal(kx, (2, 4, 16, 16), dtype=jnp.float32)
    module = DropPath(drop_prob=0.5)
    module.training = True
    out = jax.block_until_ready(module(x, key=km))
    ref = _ref_drop_path(x, 0.5, km)
    assert out.shape == x.shape and out.dtype == x.dtype
    assert jnp.allclose(out, ref, atol=1e-6, rtol=1e-6)

    # --- test 2: unaligned feature size, still a single full-dim block ---
    x2 = jax.random.normal(kx2, (3, 3, 14, 14), dtype=jnp.float32)
    out2 = jax.block_until_ready(drop_path(x2, 0.25, True, key=km2))
    ref2 = _ref_drop_path(x2, 0.25, km2)
    assert out2.shape == x2.shape and out2.dtype == x2.dtype
    assert jnp.allclose(out2, ref2, atol=1e-6, rtol=1e-6)

    # --- test 3: larger input -> tiled grid with a ragged lane-edge block ---
    x3 = jax.random.normal(kx3, (16, 3, 200, 200), dtype=jnp.float32)
    out3 = jax.block_until_ready(drop_path(x3, 0.2, True, key=km3))
    ref3 = _ref_drop_path(x3, 0.2, km3)
    assert out3.shape == x3.shape and out3.dtype == x3.dtype
    assert jnp.allclose(out3, ref3, atol=1e-5, rtol=1e-5)

    # --- test 4: bf16 input (dtype-aware sublane path, f32 scale promote) ---
    x4 = jax.random.normal(kx4, (4, 8, 14, 14), dtype=jnp.float32).astype(jnp.bfloat16)
    out4 = jax.block_until_ready(drop_path(x4, 0.3, True, key=km4))
    ref4 = _ref_drop_path(x4, 0.3, km4)
    assert out4.shape == x4.shape and out4.dtype == x4.dtype
    assert jnp.allclose(out4.astype(jnp.float32), ref4.astype(jnp.float32),
                        atol=1e-2, rtol=1e-2)

    # --- eval / drop_prob=0 path is an identity passthrough ---
    module.training = False
    out_eval = module(x)
    assert out_eval is x

    print("KERNEL_OK")
</pallas_src>

<mosaic_0001>
module attributes {stable_mosaic.version = 11 : i64} {
  func.func @_drop_path_kernel(%arg0: i32, %arg1: i32, %arg2: memref<2x1024xf32, #tpu.memory_space<vmem>>, %arg3: memref<2x1xf32, #tpu.memory_space<vmem>>, %arg4: memref<2x1024xf32, #tpu.memory_space<vmem>>) attributes {dimension_semantics = [#tpu.dimension_semantics<parallel>, #tpu.dimension_semantics<parallel>], iteration_bounds = array<i64: 1, 1>, scalar_prefetch = 0 : i64, scratch_operands = 0 : i64, tpu.core_type = #tpu.core_type<tc>, window_params = [{transform_indices = @transform_0, window_bounds = array<i64: 2, 1024>}, {transform_indices = @transform_1, window_bounds = array<i64: 2, 1>}, {transform_indices = @transform_2, window_bounds = array<i64: 2, 1024>}]} {
    %c0 = arith.constant 0 : index
    %c0_0 = arith.constant 0 : index
    %0 = vector.load %arg2[%c0, %c0_0] : memref<2x1024xf32, #tpu.memory_space<vmem>>, vector<2x1024xf32>
    %c0_1 = arith.constant 0 : index
    %c0_2 = arith.constant 0 : index
    %1 = vector.load %arg3[%c0_1, %c0_2] : memref<2x1xf32, #tpu.memory_space<vmem>>, vector<2x1xf32>
    %2 = vector.broadcast %1 : vector<2x1xf32> to vector<2x1024xf32>
    %3 = arith.mulf %0, %2 : vector<2x1024xf32>
    %c0_3 = arith.constant 0 : index
    %c0_4 = arith.constant 0 : index
    %4 = vector.load %arg4[%c0_3, %c0_4] : memref<2x1024xf32, #tpu.memory_space<vmem>>, vector<2x1024xf32>
    tpu.vector_store %arg4[%c0_3, %c0_4], %3 {strides = array<i32>} : memref<2x1024xf32, #tpu.memory_space<vmem>>, vector<2x1024xf32>,
    return
  }
  func.func @transform_0(%arg0: i32, %arg1: i32) -> (i32, i32) {
    %c0_i32 = arith.constant 0 : i32
    return %arg0, %arg1 : i32, i32
  }
  func.func @transform_1(%arg0: i32, %arg1: i32) -> (i32, i32) {
    %c0_i32 = arith.constant 0 : i32
    %c0_i32_0 = arith.constant 0 : i32
    return %arg0, %c0_i32 : i32, i32
  }
  func.func @transform_2(%arg0: i32, %arg1: i32) -> (i32, i32) {
    %c0_i32 = arith.constant 0 : i32
    return %arg0, %arg1 : i32, i32
  }
}

</mosaic_0001>

<bundles_post_ra>
// kernel: tpu_custom_call.1
= control target key start
LH: loop header
LB: loop body
LE: loop exit
PB: predicated region body
PF: predicated region fallthrough
CT: control target
= control target key end

     0   :  { %7 = vsyncpa [#allocation3], 0  ;;  %s135_s0 = inlined_call_operand.hbm [shape: f32[2,1024], index: 0, kind: input, shape index: {}]   ;;  %s136_s1 = inlined_call_operand.vmem [shape: f32[2,1], index: 1, kind: input, shape index: {}]   ;;  %s137_s2 = inlined_call_operand.hbm [shape: f32[2,1024], index: 2, kind: output, shape index: {}]  }
   0x1   :  { %8 = vsyncpa [#allocation4], 0  ;;  %s107_s9 = smov [#allocation2]  }
   0x2   :  { %s15_s10 = sshll.u32 %s107_s9, 4  ;;  %s16_s10 = int_to_ptr.vmem [resolvable:$true] %s15_s10 }
   0x3   :  { %s71_s11 = scalar_lea.vmem %s16_s10, 256  ;;  %p76_p1 = scmp.lt.s32.totalorder %s16_s10, %s16_s10 }
   0x4   :  { %p72_p0 = scmp.ne.s32.totalorder %s16_s10, %s71_s11  ;;  %p77_p2 = scmp.lt.s32.totalorder %s71_s11, %s71_s11 }
   0x6   :  { %p78_p3 = por %p77_p2, %p76_p1 }
   0x8   :  { %p79_p4 = pnand %p78_p3, %p72_p0 }
   0xa   :  { %82 = shalt.err (!%p79_p4)
}
   0xb   :  { %18 = dma.hbm_to_vmem [thread:$0]  %s135_s0, 256, %s16_s10, [#allocation3]  }
   0xc   :  { %103 = dma.done.wait [#allocation3], 256  }
   0xd   :  { %104 = vsyncadd [#allocation3], 4294967040  ;;  %v108_v0 = vmov 0   ;;  %v26_v1 = vld [vmem:[%s136_s1] sm:$0x3]  ;;  %v34_v4 = vlaneseq  ;;  %v25_v10 = vld [vmem:[#allocation2 + $0x8] sm:$0xff] }
   0xe   :  { %62 = vset.pattern.permute.xlu0 %v108_v0  ;;  %v109_v2 = vmov 269488144   ;;  %v24_v9 = vld [vmem:[#allocation2] sm:$0xff]  ;;  %s110_s16 = smov [#allocation5]  }
   0xf   :  { %29 = vperm.xlu0 %62, %v26_v1   ;;  %v32_v3 = vunpack.c.l.s4 %v109_v2  ;;  %v35_v6 = vshrl.u32 %v34_v4, 7  ;;  %s49_s0 = sshll.u32 %s110_s16, 4  ;;  %s50_s0 = int_to_ptr.vmem [resolvable:$true] %s49_s0 }
  0x10   :  { %s83_s17 = scalar_lea.vmem %s50_s0, 256  ;;  %p88_p6 = scmp.lt.s32.totalorder %s50_s0, %s50_s0 }
  0x11   :  { %v33_v5 = vunpack.c.0.s8 %v32_v3  ;;  %p84_p5 = scmp.ne.s32.totalorder %s50_s0, %s83_s17  ;;  %p89_p7 = scmp.lt.s32.totalorder %s83_s17, %s83_s17 }
  0x13   :  { %v36_v7 = vsub.s32 %v33_v5, %v35_v6  ;;  %p90_p8 = por %p89_p7, %p88_p6 }
  0x15   :  { %p91_p9 = pnand %p90_p8, %p84_p5 }
  0x8a   :  { %v30_v8 = vpop.permute.xlu0 %29 }
  0x8b   :  { %v37_v11 = vrot.slane %v30_v8, %v36_v7 }
  0x8d   :  { %v39_v12 = vmul.f32 %v37_v11, %v24_v9  ;;  %v40_v13 = vmul.f32 %v37_v11, %v25_v10 }
  0x8f   :  { %41 = vst [vmem:[#allocation5] sm:$0xff] %v39_v12  ;;  %42 = vst [vmem:[#allocation5 + $0x8] sm:$0xff] %v40_v13 }
  0x90   :  { %94 = shalt.err (!%p91_p9)
}
  0x91   :  { %52 = dma.vmem_to_hbm [thread:$0]  %s50_s0, 256, %s137_s2, [#allocation4]  }
  0x92   :  { %105 = dma.done.wait [#allocation4], 256  }
  0x93   :  { %106 = vsyncadd [#allocation4], 4294967040 }
  0x94   :  { %56 = vsyncpa [#allocation3], 1 }
  0x95   :  { %57 = vsyncpa [#allocation4], 1 }

</bundles_post_ra>
